<compile_context>
chip_gen: v7x
topology: tpu7x:2x2x1
jax: 0.10.0
libtpu: 0.0.40
codegen_flags: <defaults>
</compile_context>

<pallas_src>
import functools

import jax
import jax.numpy as jnp
from jax import lax
from jax.experimental import pallas as pl
from jax.experimental.pallas import tpu as pltpu


def _round_up(a, b):
    return (a + b - 1) // b * b


def _linear_kernel(x_ref, w_ref, b_ref, o_ref, *, precision):
    # x_ref: [tile_m, D], w_ref: [D, F] (resident), b_ref: [1, F], o_ref: [tile_m, F]
    acc = jnp.dot(
        x_ref[...],
        w_ref[...],
        preferred_element_type=jnp.float32,
        precision=precision,
    )
    o_ref[...] = (acc + b_ref[...]).astype(o_ref.dtype)


def output_process_forward(x, weight, bias, *, max_tile_m=1024,
                           precision=lax.Precision.HIGHEST):
    """poseFinal(x): x [bs, T, D] @ weight.T + bias; weight in PyTorch
    nn.Linear layout [F, D]."""
    bs, T, D = x.shape
    F, D_w = weight.shape
    assert D_w == D, (weight.shape, D)
    assert bias.shape == (F,), bias.shape

    M = bs * T
    x2 = x.reshape(M, D)                       # contiguous reshape: no HBM copy
    w_t = weight.T                             # [D, F], small one-time transpose
    b2 = bias.reshape(1, F)

    # Row tile: multiple of 8 (sublane), capped so double-buffered x+out tiles
    # stay far below the v7x 32 MiB default scoped VMEM.
    tile_m = min(max_tile_m, _round_up(M, 8))
    grid = (pl.cdiv(M, tile_m),)

    out2 = pl.pallas_call(
        functools.partial(_linear_kernel, precision=precision),
        out_shape=jax.ShapeDtypeStruct((M, F), x.dtype),
        grid_spec=pltpu.PrefetchScalarGridSpec(
            num_scalar_prefetch=0,
            grid=grid,
            in_specs=[
                pl.BlockSpec((tile_m, D), lambda i: (i, 0)),   # x rows (streamed)
                pl.BlockSpec((D, F), lambda i: (0, 0)),        # weight (resident)
                pl.BlockSpec((1, F), lambda i: (0, 0)),        # bias (resident)
            ],
            out_specs=pl.BlockSpec((tile_m, F), lambda i: (i, 0)),
        ),
        compiler_params=pltpu.CompilerParams(
            dimension_semantics=("parallel",)),
    )(x2, w_t, b2)

    return out2.reshape(bs, T, F)


if __name__ == "__main__":
    # Small shapes consistent with the module: input_feats = njoints * nfeats.
    njoints, nfeats = 8, 4
    input_feats = njoints * nfeats          # 32
    latent_dim = 32
    bs, nframes = 2, 8

    key = jax.random.PRNGKey(0)
    kx, kw, kb = jax.random.split(key, 3)
    x = jax.random.normal(kx, (bs, nframes, latent_dim), jnp.float32)
    weight = jax.random.normal(kw, (input_feats, latent_dim), jnp.float32) * 0.02
    bias = jax.random.normal(kb, (input_feats,), jnp.float32) * 0.02

    out = output_process_forward(x, weight, bias)
    jax.block_until_ready(out)

    assert out.shape == (bs, nframes, input_feats), out.shape
    assert bool(jnp.all(jnp.isfinite(out)))

    # Reference: PyTorch nn.Linear semantics  y = x @ W.T + b
    ref = jnp.einsum("btd,fd->btf", x, weight,
                     precision=lax.Precision.HIGHEST) + bias
    assert bool(jnp.allclose(out, ref, rtol=1e-5, atol=1e-5)), (
        float(jnp.max(jnp.abs(out - ref))))

    print("KERNEL_OK")
</pallas_src>

<mosaic_0001>
module attributes {stable_mosaic.version = 11 : i64} {
  func.func @_linear_kernel(%arg0: i32, %arg1: memref<16x32xf32, #tpu.memory_space<vmem>>, %arg2: memref<32x32xf32, #tpu.memory_space<vmem>>, %arg3: memref<1x32xf32, #tpu.memory_space<vmem>>, %arg4: memref<16x32xf32, #tpu.memory_space<vmem>>) attributes {dimension_semantics = [#tpu.dimension_semantics<parallel>], iteration_bounds = array<i64: 1>, scalar_prefetch = 0 : i64, scratch_operands = 0 : i64, tpu.core_type = #tpu.core_type<tc>, window_params = [{transform_indices = @transform_0, window_bounds = array<i64: 16, 32>}, {pipeline_mode = #tpu.pipeline_mode<synchronous>, transform_indices = @transform_1, window_bounds = array<i64: 32, 32>}, {pipeline_mode = #tpu.pipeline_mode<synchronous>, transform_indices = @transform_2, window_bounds = array<i64: 1, 32>}, {transform_indices = @transform_3, window_bounds = array<i64: 16, 32>}]} {
    %c0 = arith.constant 0 : index
    %c0_0 = arith.constant 0 : index
    %0 = vector.load %arg1[%c0, %c0_0] : memref<16x32xf32, #tpu.memory_space<vmem>>, vector<16x32xf32>
    %c0_1 = arith.constant 0 : index
    %c0_2 = arith.constant 0 : index
    %1 = vector.load %arg2[%c0_1, %c0_2] : memref<32x32xf32, #tpu.memory_space<vmem>>, vector<32x32xf32>
    %cst = arith.constant dense<0.000000e+00> : vector<16x32xf32>
    %2 = tpu.matmul %0, %1, %cst {dimension_numbers = #tpu.dot_dimension_numbers<[1], [0], [0], [1], [0, 0, 1, 1], [], []>, precision = #tpu.contract_precision<fp32>} : vector<16x32xf32>, vector<32x32xf32>, vector<16x32xf32> -> vector<16x32xf32>
    %c0_3 = arith.constant 0 : index
    %c0_4 = arith.constant 0 : index
    %3 = vector.load %arg3[%c0_3, %c0_4] : memref<1x32xf32, #tpu.memory_space<vmem>>, vector<1x32xf32>
    %4 = vector.broadcast %3 : vector<1x32xf32> to vector<16x32xf32>
    %5 = arith.addf %2, %4 : vector<16x32xf32>
    %c0_5 = arith.constant 0 : index
    %c0_6 = arith.constant 0 : index
    %6 = vector.load %arg4[%c0_5, %c0_6] : memref<16x32xf32, #tpu.memory_space<vmem>>, vector<16x32xf32>
    tpu.vector_store %arg4[%c0_5, %c0_6], %5 {strides = array<i32>} : memref<16x32xf32, #tpu.memory_space<vmem>>, vector<16x32xf32>,
    return
  }
  func.func @transform_0(%arg0: i32) -> (i32, i32) {
    %c0_i32 = arith.constant 0 : i32
    %c0_i32_0 = arith.constant 0 : i32
    return %arg0, %c0_i32 : i32, i32
  }
  func.func @transform_1(%arg0: i32) -> (i32, i32) {
    %c0_i32 = arith.constant 0 : i32
    %c0_i32_0 = arith.constant 0 : i32
    %c0_i32_1 = arith.constant 0 : i32
    return %c0_i32, %c0_i32_0 : i32, i32
  }
  func.func @transform_2(%arg0: i32) -> (i32, i32) {
    %c0_i32 = arith.constant 0 : i32
    %c0_i32_0 = arith.constant 0 : i32
    %c0_i32_1 = arith.constant 0 : i32
    return %c0_i32, %c0_i32_0 : i32, i32
  }
  func.func @transform_3(%arg0: i32) -> (i32, i32) {
    %c0_i32 = arith.constant 0 : i32
    %c0_i32_0 = arith.constant 0 : i32
    return %arg0, %c0_i32 : i32, i32
  }
}

</mosaic_0001>

<bundles_post_ra>
// kernel: tpu_custom_call.1
= control target key start
LH: loop header
LB: loop body
LE: loop exit
PB: predicated region body
PF: predicated region fallthrough
CT: control target
= control target key end

     0   :  { %8 = vsyncpa [#allocation3], 0  ;;  %s940_s0 = inlined_call_operand.hbm [shape: f32[16,32], index: 0, kind: input, shape index: {}]   ;;  %s941_s1 = inlined_call_operand.hbm [shape: f32[32,32], index: 1, kind: input, shape index: {}]   ;;  %s942_s2 = inlined_call_operand.vmem [shape: f32[1,32], index: 2, kind: input, shape index: {}]   ;;  %s943_s3 = inlined_call_operand.hbm [shape: f32[16,32], index: 3, kind: output, shape index: {}]  }
   0x1   :  { %9 = vsyncpa [#allocation6], 0 }
   0x2   :  { %10 = vsyncpa [#allocation4], 0  ;;  %s851_s12 = smov [#allocation2]   ;;  %s779_s16 = scalar_lea.hbm %s940_s0, 256 }
   0x3   :  { %s16_s13 = sshll.u32 %s851_s12, 4  ;;  %p780_p0 = scmp.ne.s32.totalorder %s940_s0, %s779_s16  ;;  %s17_s13 = int_to_ptr.vmem [resolvable:$true] %s16_s13 }
   0x4   :  { %p783_p1 = scmp.lt.u32.totalorder %s779_s16, %s940_s0 }
   0x6   :  { %p785_p2 = pnand %p783_p1, %p780_p0 }
   0x8   :  { %788 = shalt.err (!%p785_p2)
}
   0x9   :  { %s789_s21 = scalar_lea.vmem %s17_s13, 256  ;;  %p794_p4 = scmp.lt.s32.totalorder %s17_s13, %s17_s13 }
   0xa   :  { %p790_p3 = scmp.ne.s32.totalorder %s17_s13, %s789_s21  ;;  %p795_p5 = scmp.lt.s32.totalorder %s789_s21, %s789_s21 }
   0xc   :  { %p796_p6 = por %p795_p5, %p794_p4 }
   0xe   :  { %p797_p7 = pnand %p796_p6, %p790_p3 }
  0x10   :  { %800 = shalt.err (!%p797_p7)
}
  0x11   :  { %s852_s22 = smov 128   ;;  %s853_s23 = smov 8  }
  0x12   :  { %22 = dma.hbm_to_vmem [thread:$0]  %s940_s0, 256, %s17_s13, [#allocation3], %s852_s22, %s852_s22, %s853_s23  }
  0x13   :  { %s854_s26 = smov [#allocation5]   ;;  %s801_s30 = scalar_lea.hbm %s941_s1, 512 }
  0x14   :  { %s28_s27 = sshll.u32 %s854_s26, 4  ;;  %p802_p8 = scmp.ne.s32.totalorder %s941_s1, %s801_s30  ;;  %s29_s27 = int_to_ptr.vmem [resolvable:$true] %s28_s27 }
  0x15   :  { %p805_p9 = scmp.lt.u32.totalorder %s801_s30, %s941_s1 }
  0x17   :  { %p807_p10 = pnand %p805_p9, %p802_p8 }
  0x19   :  { %810 = shalt.err (!%p807_p10)
}
  0x1a   :  { %s811_s8 = scalar_lea.vmem %s29_s27, 512  ;;  %p816_p12 = scmp.lt.s32.totalorder %s29_s27, %s29_s27 }
  0x1b   :  { %p812_p11 = scmp.ne.s32.totalorder %s29_s27, %s811_s8  ;;  %p817_p13 = scmp.lt.s32.totalorder %s811_s8, %s811_s8 }
  0x1d   :  { %p818_p0 = por %p817_p13, %p816_p12 }
  0x1f   :  { %p819_p1 = pnand %p818_p0, %p812_p11 }
  0x21   :  { %822 = shalt.err (!%p819_p1)
}
  0x22   :  { %34 = dma.hbm_to_vmem [thread:$0]  %s941_s1, 512, %s29_s27, [#allocation6], %s852_s22, %s852_s22, %s853_s23  }
  0x23   :  { %845 = dma.done.wait [#allocation3], 256  }
  0x24   :  { %846 = vsyncadd [#allocation3], 4294967040 }
  0x25   :  { %847 = dma.done.wait [#allocation6], 512  }
  0x26   :  { %848 = vsyncadd [#allocation6], 4294966784  ;;  %vm56_vm0 = vcmask 261120   ;;  %v45_v0 = vld [vmem:[#allocation5] sm:$0xff]  ;;  %v46_v1 = vld [vmem:[#allocation5 + $0x8] sm:$0xff]  ;;  %s855_s11 = smov [#allocation7]  }
  0x27   :  { %v47_v2 = vld [vmem:[#allocation5 + $0x10] sm:$0xff]  ;;  %v64_v3 = vand.u32 4294901760, %v45_v0  ;;  %v67_v4 = vand.u32 4294901760, %v46_v1  ;;  %v48_v5 = vld [vmem:[#allocation5 + $0x18] sm:$0xff]  ;;  %s598_s12 = sshll.u32 %s855_s11, 4  ;;  %s599_s12 = int_to_ptr.vmem [resolvable:$true] %s598_s12 }
  0x28   :  { %v70_v6 = vand.u32 4294901760, %v47_v2  ;;  %v43_v7 = vld [vmem:[#allocation2] sm:$0xff]  ;;  %v44_v8 = vld [vmem:[#allocation2 + $0x8] sm:$0xff]  ;;  %v73_v9 = vand.u32 4294901760, %v48_v5  ;;  %s823_s13 = scalar_lea.vmem %s599_s12, 256  ;;  %p828_p3 = scmp.lt.s32.totalorder %s599_s12, %s599_s12 }
  0x29   :  { %v58_v10 = vsel %vm56_vm0, %v43_v7, 0  ;;  %v61_v11 = vsel %vm56_vm0, %v44_v8, 0  ;;  %v714_v12 = vpack.c.bf16 %v67_v4, %v64_v3  ;;  %v154_v15 = vsub.f32 %v45_v0, %v64_v3  ;;  %v611_v46 = vld [vmem:[%s942_s2] ss:$0 sm:$0xff]  ;;  %p824_p2 = scmp.ne.s32.totalorder %s599_s12, %s823_s13  ;;  %p829_p4 = scmp.lt.s32.totalorder %s823_s13, %s823_s13 }
  0x2a   :  { %v908_v13 = vand.u32 4294901760, %v58_v10  ;;  %v910_v14 = vand.u32 4294901760, %v61_v11  ;;  %v718_v16 = vpack.c.bf16 %v73_v9, %v70_v6  ;;  %v161_v17 = vsub.f32 %v46_v1, %v67_v4 }
  0x2b   :  { %v168_v18 = vsub.f32 %v47_v2, %v70_v6  ;;  %v175_v19 = vsub.f32 %v48_v5, %v73_v9  ;;  %715 = vmatprep.subr.bf16.mxu1 %v714_v12  ;;  %739 = vmatprep.subr.bf16.mxu0 %v714_v12  ;;  %v155_v22 = vand.u32 4294901760, %v154_v15  ;;  %p830_p5 = por %p829_p4, %p828_p3 }
  0x2c   :  { %v133_v20 = vsub.f32 %v58_v10, %v908_v13  ;;  %v143_v21 = vsub.f32 %v61_v11, %v910_v14  ;;  %717 = vmatpush3.bf16.msra.mxu1 %v714_v12  ;;  %741 = vmatpush3.bf16.msra.mxu0 %v714_v12  ;;  %v162_v23 = vand.u32 4294901760, %v161_v17  ;;  %v730_v44 = vpack.c.bf16 %v161_v17, %v154_v15 }
  0x2d   :  { %v169_v24 = vand.u32 4294901760, %v168_v18  ;;  %v176_v25 = vand.u32 4294901760, %v175_v19  ;;  %719 = vmatprep.subr.bf16.mxu1 %v718_v16  ;;  %743 = vmatprep.subr.bf16.mxu0 %v718_v16  ;;  %v156_v28 = vsub.f32 %v154_v15, %v155_v22  ;;  %v734_v45 = vpack.c.bf16 %v175_v19, %v168_v18  ;;  %p831_p6 = pnand %p830_p5, %p824_p2 }
  0x2e   :  { %v134_v26 = vand.u32 4294901760, %v133_v20  ;;  %v144_v27 = vand.u32 4294901760, %v143_v21  ;;  %v163_v29 = vsub.f32 %v161_v17, %v162_v23  ;;  %v746_v30 = vpack.c.bf16 %v162_v23, %v155_v22 }
  0x2f   :  { %v170_v31 = vsub.f32 %v168_v18, %v169_v24  ;;  %v177_v32 = vsub.f32 %v175_v19, %v176_v25  ;;  %v157_v35 = vand.u32 4294901760, %v156_v28  ;;  %v750_v43 = vpack.c.bf16 %v176_v25, %v169_v24 }
  0x30   :  { %v135_v33 = vsub.f32 %v133_v20, %v134_v26  ;;  %689 = vmatprep.mubr.f32.mxu0 %v134_v26  ;;  %v145_v34 = vsub.f32 %v143_v21, %v144_v27  ;;  %721 = vmatpush3.bf16.msra.mxu1 %v718_v16  ;;  %v164_v36 = vand.u32 4294901760, %v163_v29 }
  0x31   :  { %745 = vmatpush3.bf16.msra.mxu0 %v718_v16  ;;  %v171_v37 = vand.u32 4294901760, %v170_v31  ;;  %v178_v38 = vand.u32 4294901760, %v177_v32 }
  0x32   :  { %v136_v39 = vand.u32 4294901760, %v135_v33  ;;  %v146_v40 = vand.u32 4294901760, %v145_v34  ;;  %747 = vmatprep.subr.bf16.mxu0 %v746_v30  ;;  %v722_v41 = vpack.c.bf16 %v164_v36, %v157_v35 }
  0x33   :  { %v726_v42 = vpack.c.bf16 %v178_v38, %v171_v37 }
  0x34   :  { %656 = vmatprep.mubr.f32.mxu1 %v136_v39  ;;  %690 = vmatmul.mubr.f32.vlgmr.msra.gmra.mrb[0].mxu0 %v144_v27 }
  0x35   :  { %657 = vmatmul.mubr.f32.vlgmr.msra.gmra.mrb[0].mxu1 %v146_v40  ;;  %723 = vmatprep.subr.bf16.mxu1 %v722_v41 }
  0x36   :  { %725 = vmatpush3.bf16.msra.mxu1 %v722_v41  ;;  %749 = vmatpush3.bf16.msra.mxu0 %v746_v30 }
  0x37   :  { %727 = vmatprep.subr.bf16.mxu1 %v726_v42  ;;  %751 = vmatprep.subr.bf16.mxu0 %v750_v43 }
  0x38   :  { %667 = vmatprep.mubr.f32.mxu1 %v908_v13  ;;  %700 = vmatprep.mubr.f32.mxu0 %v908_v13 }
  0x3a   :  { %729 = vmatpush3.bf16.msra.mxu1 %v726_v42  ;;  %753 = vmatpush3.bf16.msra.mxu0 %v750_v43 }
  0x3b   :  { %731 = vmatprep.subr.bf16.mxu1 %v730_v44  ;;  %755 = vmatprep.subr.bf16.mxu0 %v714_v12 }
  0x3d   :  { %668 = vmatmul.mubr.f32.vlgmr.msra.gmra.mrb[0].mxu1 %v910_v14  ;;  %701 = vmatmul.mubr.f32.vlgmr.msra.gmra.mrb[0].mxu0 %v910_v14 }
  0x3e   :  { %733 = vmatpush3.bf16.msra.mxu1 %v730_v44  ;;  %757 = vmatpush3.bf16.msra.mxu0 %v714_v12 }
  0x3f   :  { %735 = vmatprep.subr.bf16.mxu1 %v734_v45  ;;  %759 = vmatprep.subr.bf16.mxu0 %v718_v16 }
  0x40   :  { %678 = vmatprep.mubr.f32.mxu1 %v133_v20  ;;  %711 = vmatprep.mubr.f32.mxu0 %v908_v13 }
  0x42   :  { %737 = vmatpush3.bf16.msra.mxu1 %v734_v45  ;;  %761 = vmatpush3.bf16.msra.mxu0 %v718_v16 }
  0x45   :  { %679 = vmatmul.mubr.f32.vlgmr.msra.gmra.mrb[0].mxu1 %v143_v21  ;;  %712 = vmatmul.mubr.f32.vlgmr.msra.gmra.mrb[0].mxu0 %v910_v14 }
 0x118   :  { %v680_v47 = vpop.f32.mrb[0].mxu1  ;;  %v713_v48 = vpop.f32.mrb[0].mxu0 }
 0x119   :  { %v762_v49 = vadd.f32 %v680_v47, %v611_v46  ;;  %v325_v50 = vpop.f32.mrb[1].mxu1  ;;  %v581_v51 = vpop.f32.mrb[1].mxu0 }
 0x11a   :  { %v764_v52 = vadd.f32 %v611_v46, %v325_v50 }
 0x11b   :  { %v763_v53 = vadd.f32 %v762_v49, %v713_v48 }
 0x11c   :  { %v765_v54 = vadd.f32 %v764_v52, %v581_v51 }
 0x11d   :  { %592 = vst.msk [vmem:[#allocation7 + $0x8] sm:$0xff] %vm56_vm0, %v763_v53 }
 0x11e   :  { %591 = vst.msk [vmem:[#allocation7] sm:$0xff] %vm56_vm0, %v765_v54 }
 0x11f   :  { %834 = shalt.err (!%p831_p6)
}
 0x120   :  { %s835_s15 = scalar_lea.hbm %s943_s3, 256 }
 0x121   :  { %p836_p7 = scmp.ne.s32.totalorder %s943_s3, %s835_s15  ;;  %p839_p8 = scmp.lt.u32.totalorder %s835_s15, %s943_s3 }
 0x123   :  { %p841_p9 = pnand %p839_p8, %p836_p7 }
 0x125   :  { %844 = shalt.err (!%p841_p9)
}
 0x126   :  { %604 = dma.vmem_to_hbm [thread:$0]  %s599_s12, 256, %s943_s3, [#allocation4], %s852_s22, %s852_s22, %s853_s23  }
 0x127   :  { %849 = dma.done.wait [#allocation4], 256  }
 0x128   :  { %850 = vsyncadd [#allocation4], 4294967040 }
 0x129   :  { %608 = vsyncpa [#allocation3], 1 }
 0x12a   :  { %609 = vsyncpa [#allocation6], 1 }
 0x12b   :  { %610 = vsyncpa [#allocation4], 1 }

</bundles_post_ra>
